<compile_context>
chip_gen: v6e
topology: v6e:2x2x1
jax: 0.10.0
libtpu: 0.0.40
codegen_flags: <defaults>
</compile_context>

<pallas_src>
import functools
import math

import jax
import jax.numpy as jnp
from jax.experimental import pallas as pl
from jax.experimental.pallas import tpu as pltpu


def _round_up(x, m):
    return ((x + m - 1) // m) * m


def mf_kernel(u_ref, i_ref, out_ref):
    # u_ref, i_ref: (TB, K) gathered embedding tiles in VMEM.
    # out_ref:      (1, TB) lane-dense output slab for this batch tile.
    prod = u_ref[...] * i_ref[...]                 # VPU, full vregs
    out_ref[...] = jnp.sum(prod, axis=1)[None, :]  # K-reduce on XLU, lane-dense store


@functools.partial(jax.jit, static_argnames=("feature_size", "tb"))
def mf_forward(x, user_params, item_params, feature_size, tb=1024):
    """Pallas equivalent of MF.forward."""
    assert feature_size >= 2, "need user id and item id columns"
    B = x.shape[0]
    K = user_params.shape[1]

    # id extraction (glue, mirrors x[:, -feature_size].long() etc.)
    u_ids = x[:, -feature_size].astype(jnp.int32).reshape(-1)
    i_ids = x[:, -(feature_size - 1)].astype(jnp.int32).reshape(-1)

    # Coalesced gather in the wrapper: dense (B, K) slabs feed the kernel.
    u_rows = jnp.take(user_params, u_ids, axis=0)
    i_rows = jnp.take(item_params, i_ids, axis=0)

    # Tile the batch: TB rows per grid step, lane-dense output.
    tb_eff = min(tb, _round_up(B, 128))            # multiple of 128 (and of 8)
    B_pad = _round_up(B, tb_eff)
    if B_pad != B:
        pad = B_pad - B
        u_rows = jnp.pad(u_rows, ((0, pad), (0, 0)))
        i_rows = jnp.pad(i_rows, ((0, pad), (0, 0)))
    num_blocks = B_pad // tb_eff

    out = pl.pallas_call(
        mf_kernel,
        grid_spec=pl.GridSpec(
            grid=(num_blocks,),
            in_specs=[
                pl.BlockSpec((tb_eff, K), lambda b: (b, 0)),
                pl.BlockSpec((tb_eff, K), lambda b: (b, 0)),
            ],
            out_specs=pl.BlockSpec((1, tb_eff), lambda b: (0, b)),
        ),
        out_shape=jax.ShapeDtypeStruct((1, B_pad), jnp.float32),
        compiler_params=pltpu.CompilerParams(
            dimension_semantics=("parallel",)),
        cost_estimate=pl.CostEstimate(
            flops=2 * B_pad * K,
            transcendentals=0,
            bytes_accessed=2 * B_pad * K * 4 + B_pad * 4),
    )(u_rows, i_rows)

    return out[0, :B]


def xavier_normal(key, shape):
    # torch.nn.init.xavier_normal_ on a 2D tensor: fan_out = shape[0], fan_in = shape[1]
    fan_out, fan_in = shape
    std = math.sqrt(2.0 / (fan_in + fan_out))
    return std * jax.random.normal(key, shape, dtype=jnp.float32)


if __name__ == "__main__":
    # small, deterministic setup consistent with the module's __init__/forward
    max_uid = 15          # -> user table has max_uid + 1 rows
    max_mid = 23          # -> item table has max_mid + 1 rows
    k = 32                # embedding dim
    feature_size = 4      # x has feature_size trailing columns; ids are the first two of them
    batch = 8

    key = jax.random.PRNGKey(0)
    k_user, k_item, k_u, k_i, k_rest = jax.random.split(key, 5)

    user_params = xavier_normal(k_user, (max_uid + 1, k))
    item_params = xavier_normal(k_item, (max_mid + 1, k))

    # build x: [batch, feature_size]; user id at column -feature_size,
    # item id at column -(feature_size - 1), remaining columns are dummies.
    u_ids = jax.random.randint(k_u, (batch,), 0, max_uid + 1)
    i_ids = jax.random.randint(k_i, (batch,), 0, max_mid + 1)
    rest = jax.random.normal(k_rest, (batch, feature_size - 2), dtype=jnp.float32)
    x = jnp.concatenate(
        [u_ids[:, None].astype(jnp.float32),
         i_ids[:, None].astype(jnp.float32),
         rest],
        axis=1,
    )

    out = mf_forward(x, user_params, item_params, feature_size)
    out = jax.block_until_ready(out)

    # pure-JAX reference of the PyTorch semantics
    ref = jnp.sum(user_params[u_ids] * item_params[i_ids], axis=1)
    assert out.shape == (batch,)
    assert jnp.allclose(out, ref, atol=1e-5, rtol=1e-5)

    print("KERNEL_OK")
</pallas_src>

<mosaic_0001>
module attributes {stable_mosaic.version = 11 : i64} {
  func.func @mf_kernel(%arg0: i32, %arg1: memref<128x32xf32, #tpu.memory_space<vmem>>, %arg2: memref<128x32xf32, #tpu.memory_space<vmem>>, %arg3: memref<1x128xf32, #tpu.memory_space<vmem>>) attributes {dimension_semantics = [#tpu.dimension_semantics<parallel>], iteration_bounds = array<i64: 1>, scalar_prefetch = 0 : i64, scratch_operands = 0 : i64, tpu.core_type = #tpu.core_type<tc>, window_params = [{transform_indices = @transform_0, window_bounds = array<i64: 128, 32>}, {transform_indices = @transform_1, window_bounds = array<i64: 128, 32>}, {transform_indices = @transform_2, window_bounds = array<i64: 1, 128>}]} {
    %c0 = arith.constant 0 : index
    %c0_0 = arith.constant 0 : index
    %0 = vector.load %arg1[%c0, %c0_0] : memref<128x32xf32, #tpu.memory_space<vmem>>, vector<128x32xf32>
    %c0_1 = arith.constant 0 : index
    %c0_2 = arith.constant 0 : index
    %1 = vector.load %arg2[%c0_1, %c0_2] : memref<128x32xf32, #tpu.memory_space<vmem>>, vector<128x32xf32>
    %2 = arith.mulf %0, %1 : vector<128x32xf32>
    %cst = arith.constant dense<0.000000e+00> : vector<128xf32>
    %3 = vector.multi_reduction <add>, %2, %cst [1] : vector<128x32xf32> to vector<128xf32>
    %4 = vector.shape_cast %3 : vector<128xf32> to vector<1x128xf32>
    %c0_3 = arith.constant 0 : index
    %c0_4 = arith.constant 0 : index
    %5 = vector.load %arg3[%c0_3, %c0_4] : memref<1x128xf32, #tpu.memory_space<vmem>>, vector<1x128xf32>
    tpu.vector_store %arg3[%c0_3, %c0_4], %4 {strides = array<i32>} : memref<1x128xf32, #tpu.memory_space<vmem>>, vector<1x128xf32>,
    return
  }
  func.func @transform_0(%arg0: i32) -> (i32, i32) {
    %c0_i32 = arith.constant 0 : i32
    %c0_i32_0 = arith.constant 0 : i32
    return %arg0, %c0_i32 : i32, i32
  }
  func.func @transform_1(%arg0: i32) -> (i32, i32) {
    %c0_i32 = arith.constant 0 : i32
    %c0_i32_0 = arith.constant 0 : i32
    return %arg0, %c0_i32 : i32, i32
  }
  func.func @transform_2(%arg0: i32) -> (i32, i32) {
    %c0_i32 = arith.constant 0 : i32
    %c0_i32_0 = arith.constant 0 : i32
    return %c0_i32, %arg0 : i32, i32
  }
}

</mosaic_0001>

<bundles_post_ra>
// kernel: mf_forward.1
= control target key start
LH: loop header
LB: loop body
LE: loop exit
PB: predicated region body
PF: predicated region fallthrough
CT: control target
= control target key end

     0   :  { %vm59_vm0 = vcmask 261120   ;;  %vm135_vm1 = vcmask 130112   ;;  %vm142_vm2 = vcmask 195712   ;;  %vm149_vm3 = vcmask 261312   ;;  %s407_s0 = inlined_call_operand.vmem [shape: f32[128,32], index: 0, kind: input, shape index: {}]   ;;  %s408_s1 = inlined_call_operand.vmem [shape: f32[128,32], index: 1, kind: input, shape index: {}]   ;;  %s409_s2 = inlined_call_operand.vmem [shape: f32[1,128], index: 2, kind: output, shape index: {}]  }
   0x1   :  { %v11_v0 = vld [vmem:[%s407_s0] sm:$0xff]  ;;  %v13_v2 = vld [vmem:[%s407_s0 + $0x10] sm:$0xff]  ;;  %v12_v5 = vld [vmem:[%s407_s0 + $0x8] sm:$0xff]  ;;  %vm156_vm4 = vcmask 326912   ;;  %vm163_vm5 = vcmask 392512   ;;  %vm170_vm6 = vcmask 458112  }
   0x2   :  { %v27_v1 = vld [vmem:[%s408_s1] sm:$0xff]  ;;  %v29_v4 = vld [vmem:[%s408_s1 + $0x10] sm:$0xff]  ;;  %v28_v6 = vld [vmem:[%s408_s1 + $0x8] sm:$0xff]  ;;  %vm177_vm7 = vcmask 523712   ;;  %vm184_vm8 = vcmask 589312   ;;  %vm191_vm9 = vcmask 654912  }
   0x3   :  { %v43_v3 = vmul.f32 %v27_v1, %v11_v0  ;;  %v45_v7 = vmul.f32 %v29_v4, %v13_v2  ;;  %v44_v8 = vmul.f32 %v28_v6, %v12_v5  ;;  %v14_v9 = vld [vmem:[%s407_s0 + $0x18] sm:$0xff]  ;;  %v15_v11 = vld [vmem:[%s407_s0 + $0x20] sm:$0xff]  ;;  %v16_v15 = vld [vmem:[%s407_s0 + $0x28] sm:$0xff]  ;;  %v124_v0 = vlaneseq }
   0x4   :  { %v30_v10 = vld [vmem:[%s408_s1 + $0x18] sm:$0xff]  ;;  %v31_v14 = vld [vmem:[%s408_s1 + $0x20] sm:$0xff]  ;;  %v32_v16 = vld [vmem:[%s408_s1 + $0x28] sm:$0xff]  ;;  %vm198_vm10 = vcmask 720512   ;;  %vm205_vm11 = vcmask 786112   ;;  %vm212_vm12 = vcmask 851712  }
   0x5   :  { %v60_v12 = vsel %vm59_vm0, %v43_v3, 0.0  ;;  %v46_v13 = vmul.f32 %v30_v10, %v14_v9  ;;  %v66_v17 = vsel %vm59_vm0, %v45_v7, 0.0  ;;  %v63_v18 = vsel %vm59_vm0, %v44_v8, 0.0  ;;  %v17_v22 = vld [vmem:[%s407_s0 + $0x30] sm:$0xff]  ;;  %v18_v24 = vld [vmem:[%s407_s0 + $0x38] sm:$0xff]  ;;  %v19_v30 = vld [vmem:[%s407_s0 + $0x40] sm:$0xff] }
   0x6   :  { %61 = vadd.xlane.f32.xlu0 %v60_v12  ;;  %67 = vadd.xlane.f32.xlu1 %v66_v17  ;;  %v47_v19 = vmul.f32 %v31_v14, %v15_v11  ;;  %v48_v21 = vmul.f32 %v32_v16, %v16_v15  ;;  %v33_v23 = vld [vmem:[%s408_s1 + $0x30] sm:$0xff]  ;;  %v34_v25 = vld [vmem:[%s408_s1 + $0x38] sm:$0xff]  ;;  %v35_v31 = vld [vmem:[%s408_s1 + $0x40] sm:$0xff]  ;;  %v368_v1 = vand.u32 127, %v124_v0  ;;  %v370_v2 = vshrl.u32 %v124_v0, 7 }
   0x7   :  { %v69_v20 = vsel %vm59_vm0, %v46_v13, 0.0  ;;  %v49_v27 = vmul.f32 %v33_v23, %v17_v22  ;;  %v50_v29 = vmul.f32 %v34_v25, %v18_v24  ;;  %v20_v32 = vld [vmem:[%s407_s0 + $0x48] sm:$0xff]  ;;  %v51_v35 = vmul.f32 %v35_v31, %v19_v30  ;;  %v21_v38 = vld [vmem:[%s407_s0 + $0x50] sm:$0xff]  ;;  %v22_v40 = vld [vmem:[%s407_s0 + $0x58] sm:$0xff] }
   0x8   :  { %v72_v26 = vsel %vm59_vm0, %v47_v19, 0.0  ;;  %v75_v28 = vsel %vm59_vm0, %v48_v21, 0.0  ;;  %v36_v33 = vld [vmem:[%s408_s1 + $0x48] sm:$0xff]  ;;  %v37_v39 = vld [vmem:[%s408_s1 + $0x50] sm:$0xff]  ;;  %v38_v41 = vld [vmem:[%s408_s1 + $0x58] sm:$0xff]  ;;  %v130_v3 = vadd.s32 4294967288, %v368_v1  ;;  %v128_v7 = vsub.s32 %v368_v1, %v370_v2 }
   0x9   :  { %v78_v34 = vsel %vm59_vm0, %v49_v27, 0.0  ;;  %v81_v36 = vsel %vm59_vm0, %v50_v29, 0.0  ;;  %v52_v37 = vmul.f32 %v36_v33, %v20_v32  ;;  %v84_v42 = vsel %vm59_vm0, %v51_v35, 0.0  ;;  %v23_v46 = vld [vmem:[%s407_s0 + $0x60] sm:$0xff]  ;;  %v24_v48 = vld [vmem:[%s407_s0 + $0x68] sm:$0xff]  ;;  %v25_v54 = vld [vmem:[%s407_s0 + $0x70] sm:$0xff] }
   0xa   :  { %64 = vadd.xlane.f32.xlu0 %v63_v18  ;;  %70 = vadd.xlane.f32.xlu1 %v69_v20  ;;  %v53_v43 = vmul.f32 %v37_v39, %v21_v38  ;;  %v54_v45 = vmul.f32 %v38_v41, %v22_v40  ;;  %v39_v47 = vld [vmem:[%s408_s1 + $0x60] sm:$0xff]  ;;  %v40_v49 = vld [vmem:[%s408_s1 + $0x68] sm:$0xff]  ;;  %v41_v55 = vld [vmem:[%s408_s1 + $0x70] sm:$0xff]  ;;  %v137_v4 = vadd.s32 4294967280, %v368_v1  ;;  %v144_v5 = vadd.s32 4294967272, %v368_v1 }
   0xb   :  { %v87_v44 = vsel %vm59_vm0, %v52_v37, 0.0  ;;  %v55_v51 = vmul.f32 %v39_v47, %v23_v46  ;;  %v56_v53 = vmul.f32 %v40_v49, %v24_v48  ;;  %v26_v56 = vld [vmem:[%s407_s0 + $0x78] sm:$0xff]  ;;  %v57_v59 = vmul.f32 %v41_v55, %v25_v54 }
   0xc   :  { %v90_v50 = vsel %vm59_vm0, %v53_v43, 0.0  ;;  %v93_v52 = vsel %vm59_vm0, %v54_v45, 0.0  ;;  %v42_v57 = vld [vmem:[%s408_s1 + $0x78] sm:$0xff]  ;;  %v133_v9 = vsub.s32 %v130_v3, %v370_v2  ;;  %v151_v10 = vadd.s32 4294967264, %v368_v1 }
   0xd   :  { %v96_v58 = vsel %vm59_vm0, %v55_v51, 0.0  ;;  %v99_v60 = vsel %vm59_vm0, %v56_v53, 0.0  ;;  %v58_v61 = vmul.f32 %v42_v57, %v26_v56  ;;  %v102_v62 = vsel %vm59_vm0, %v57_v59, 0.0 }
   0xe   :  { %73 = vadd.xlane.f32.xlu0 %v72_v26  ;;  %76 = vadd.xlane.f32.xlu1 %v75_v28  ;;  %v140_v11 = vsub.s32 %v137_v4, %v370_v2  ;;  %v147_v12 = vsub.s32 %v144_v5, %v370_v2  ;;  %v158_v13 = vadd.s32 4294967256, %v368_v1  ;;  %v154_v18 = vsub.s32 %v151_v10, %v370_v2 }
   0xf   :  { %v105_v63 = vsel %vm59_vm0, %v58_v61, 0.0  ;;  %v165_v19 = vadd.s32 4294967248, %v368_v1  ;;  %v172_v23 = vadd.s32 4294967240, %v368_v1  ;;  %v179_v31 = vadd.s32 4294967232, %v368_v1 }
  0x10   :  { %v161_v22 = vsub.s32 %v158_v13, %v370_v2  ;;  %v193_v40 = vadd.s32 4294967216, %v368_v1  ;;  %v214_v54 = vadd.s32 4294967192, %v368_v1  ;;  %v228_v0 = vadd.s32 4294967176, %v368_v1 }
  0x11   :  { %v168_v30 = vsub.s32 %v165_v19, %v370_v2  ;;  %v175_v33 = vsub.s32 %v172_v23, %v370_v2  ;;  %v182_v39 = vsub.s32 %v179_v31, %v370_v2  ;;  %vm219_vm13 = vcmask 917312  }
  0x12   :  { %79 = vadd.xlane.f32.xlu0 %v78_v34  ;;  %82 = vadd.xlane.f32.xlu1 %v81_v36  ;;  %v186_v34 = vadd.s32 4294967224, %v368_v1  ;;  %v196_v49 = vsub.s32 %v193_v40, %v370_v2  ;;  %v231_v10 = vsub.s32 %v228_v0, %v370_v2  ;;  %vm226_vm14 = vcmask 982912  }
  0x13   :  { %vm233_vm15 = vcmask 1048512  }
  0x14   :  { %v189_v43 = vsub.s32 %v186_v34, %v370_v2 }
  0x16   :  { %85 = vadd.xlane.f32.xlu0 %v84_v42  ;;  %88 = vadd.xlane.f32.xlu1 %v87_v44  ;;  %v200_v44 = vadd.s32 4294967208, %v368_v1 }
  0x18   :  { %v203_v53 = vsub.s32 %v200_v44, %v370_v2 }
  0x1a   :  { %91 = vadd.xlane.f32.xlu0 %v90_v50  ;;  %94 = vadd.xlane.f32.xlu1 %v93_v52  ;;  %v207_v50 = vadd.s32 4294967200, %v368_v1 }
  0x1c   :  { %v210_v59 = vsub.s32 %v207_v50, %v370_v2 }
  0x1e   :  { %97 = vadd.xlane.f32.xlu0 %v96_v58  ;;  %100 = vadd.xlane.f32.xlu1 %v99_v60  ;;  %v221_v60 = vadd.s32 4294967184, %v368_v1 }
  0x22   :  { %103 = vadd.xlane.f32.xlu0 %v102_v62  ;;  %106 = vadd.xlane.f32.xlu1 %v105_v63  ;;  %v217_v63 = vsub.s32 %v214_v54, %v370_v2 }
  0x8f   :  { %v62_v6 = vpop.xlane.xlu0 %61  ;;  %v68_v8 = vpop.xlane.xlu1 %67 }
  0x90   :  { %v129_v15 = vrot.slane %v62_v6, %v128_v7  ;;  %v141_v20 = vrot.slane %v68_v8, %v140_v11  ;;  %v224_v7 = vsub.s32 %v221_v60, %v370_v2 }
  0x93   :  { %v65_v14 = vpop.xlane.xlu0 %64  ;;  %v71_v17 = vpop.xlane.xlu1 %70 }
  0x94   :  { %v134_v16 = vrot.slane %v65_v14, %v133_v9  ;;  %v148_v21 = vrot.slane %v71_v17, %v147_v12 }
  0x96   :  { %v136_v24 = vsel %vm135_vm1, %v134_v16, %v129_v15 }
  0x97   :  { %v143_v25 = vsel %vm142_vm2, %v141_v20, %v136_v24  ;;  %v74_v26 = vpop.xlane.xlu0 %73  ;;  %v77_v29 = vpop.xlane.xlu1 %76 }
  0x98   :  { %v150_v27 = vsel %vm149_vm3, %v148_v21, %v143_v25  ;;  %v155_v28 = vrot.slane %v74_v26, %v154_v18  ;;  %v162_v32 = vrot.slane %v77_v29, %v161_v22 }
  0x9a   :  { %v157_v35 = vsel %vm156_vm4, %v155_v28, %v150_v27 }
  0x9b   :  { %v80_v36 = vpop.xlane.xlu0 %79  ;;  %v83_v38 = vpop.xlane.xlu1 %82  ;;  %v164_v41 = vsel %vm163_vm5, %v162_v32, %v157_v35 }
  0x9c   :  { %v169_v37 = vrot.slane %v80_v36, %v168_v30  ;;  %v176_v42 = vrot.slane %v83_v38, %v175_v33 }
  0x9e   :  { %v171_v45 = vsel %vm170_vm6, %v169_v37, %v164_v41 }
  0x9f   :  { %v86_v46 = vpop.xlane.xlu0 %85  ;;  %v89_v48 = vpop.xlane.xlu1 %88  ;;  %v178_v51 = vsel %vm177_vm7, %v176_v42, %v171_v45 }
  0xa0   :  { %v183_v47 = vrot.slane %v86_v46, %v182_v39  ;;  %v190_v52 = vrot.slane %v89_v48, %v189_v43 }
  0xa2   :  { %v185_v55 = vsel %vm184_vm8, %v183_v47, %v178_v51 }
  0xa3   :  { %v92_v56 = vpop.xlane.xlu0 %91  ;;  %v95_v58 = vpop.xlane.xlu1 %94  ;;  %v192_v61 = vsel %vm191_vm9, %v190_v52, %v185_v55 }
  0xa4   :  { %v197_v57 = vrot.slane %v92_v56, %v196_v49  ;;  %v204_v62 = vrot.slane %v95_v58, %v203_v53 }
  0xa6   :  { %v199_v3 = vsel %vm198_vm10, %v197_v57, %v192_v61 }
  0xa7   :  { %v98_v4 = vpop.xlane.xlu0 %97  ;;  %v101_v6 = vpop.xlane.xlu1 %100  ;;  %v206_v8 = vsel %vm205_vm11, %v204_v62, %v199_v3 }
  0xa8   :  { %v211_v5 = vrot.slane %v98_v4, %v210_v59  ;;  %v218_v9 = vrot.slane %v101_v6, %v217_v63 }
  0xaa   :  { %v213_v11 = vsel %vm212_vm12, %v211_v5, %v206_v8 }
  0xab   :  { %v104_v12 = vpop.xlane.xlu0 %103  ;;  %v107_v14 = vpop.xlane.xlu1 %106  ;;  %v220_v1 = vsel %vm219_vm13, %v218_v9, %v213_v11 }
  0xac   :  { %v225_v13 = vrot.slane %v104_v12, %v224_v7  ;;  %v232_v15 = vrot.slane %v107_v14, %v231_v10 }
  0xae   :  { %v227_v16 = vsel %vm226_vm14, %v225_v13, %v220_v1 }
  0xaf   :  { %v234_v17 = vsel %vm233_vm15, %v232_v15, %v227_v16 }
  0xb0   :  { %236 = vst [vmem:[%s409_s2] sm:$0x1] %v234_v17 }

</bundles_post_ra>
